<compile_context>
chip_gen: v5e
topology: v5e:2x2
jax: 0.10.0
libtpu: 0.0.40
codegen_flags: <defaults>
</compile_context>

<pallas_src>
import functools

import jax
import jax.numpy as jnp
from jax.experimental import pallas as pl
from jax.experimental.pallas import tpu as pltpu

_LANE = 128
_SUB = 8
_SEG = 16  # segment-start alignment in the packed slab (safe for bf16 row packing)


def _round_up(x, m):
    return (x + m - 1) // m * m


def _choose_batch_tiling(B, max_tile=2048):
    """Pick (TB, B_pad).

    TB is a multiple of 8 and <= max_tile; B_pad is B rounded up to a multiple of
    TB (padding rows are zeros, computed and sliced off — a few rows at most per
    tile). Whenever B >= 16 there are at least 2 grid tiles so the batch axis can
    shard across v7x's two TensorCores, and we never fall back to one giant
    whole-batch tile that could blow scoped VMEM.
    """
    if B <= _SUB:
        return B, B  # single tiny tile; block == full array dims, always legal
    B8 = _round_up(B, _SUB)
    if B8 <= 2 * _SUB:
        tb = _SUB
    else:
        tb = min(max_tile, _round_up(B8 // 2, _SUB))
    return tb, _round_up(B8, tb)


def prepare_params(params, dtype=jnp.bfloat16):
    """One-time pack of PyTorch-convention (out,in) weights into a single (R, H)
    slab: [W1^T | b1 | W2^T | b2 | W3^T | b3].

    Features are zero-padded to H = round_up(max(F1,F2,A), 128) lanes so all
    in-kernel loads are lane-dense; each segment starts on a 16-row boundary so
    the in-kernel row slices are free, aligned views for f32 and bf16 alike.
    """
    w1, b1 = params["w1"], params["b1"]   # (F1, S), (F1,)
    w2, b2 = params["w2"], params["b2"]   # (F2, F1), (F2,)
    w3, b3 = params["w3"], params["b3"]   # (A, F2),  (A,)
    F1, S = w1.shape
    F2 = w2.shape[0]
    A = w3.shape[0]

    H = _round_up(max(F1, F2, A), _LANE)
    Sp = _round_up(S, _SUB)

    off_w1 = 0
    off_b1 = _round_up(Sp, _SEG)
    off_w2 = off_b1 + _SEG
    off_b2 = off_w2 + _round_up(H, _SEG)
    off_w3 = off_b2 + _SEG
    off_b3 = off_w3 + _round_up(H, _SEG)
    R = off_b3 + _SEG

    packed = jnp.zeros((R, H), dtype)
    packed = packed.at[off_w1:off_w1 + S, :F1].set(w1.T.astype(dtype))
    packed = packed.at[off_b1, :F1].set(b1.astype(dtype))
    packed = packed.at[off_w2:off_w2 + F1, :F2].set(w2.T.astype(dtype))
    packed = packed.at[off_b2, :F2].set(b2.astype(dtype))
    packed = packed.at[off_w3:off_w3 + F2, :A].set(w3.T.astype(dtype))
    packed = packed.at[off_b3, :A].set(b3.astype(dtype))

    meta = dict(S=S, Sp=Sp, H=H, A=A, R=R,
                off_b1=off_b1, off_w2=off_w2, off_b2=off_b2,
                off_w3=off_w3, off_b3=off_b3)
    return packed, meta


def _qnet_kernel(x_ref, p_ref, out_ref, *, S, Sp, H, A,
                 off_b1, off_w2, off_b2, off_w3, off_b3):
    cdt = p_ref.dtype  # compute/storage dtype of the weight slab (bf16 or f32)

    x = x_ref[...].astype(cdt)                      # (TB, S)
    if S != Sp:                                     # static; no-op for S=8
        x = jnp.pad(x, ((0, 0), (0, Sp - S)))

    # Static, aligned views into the packed parameter slab (free views, no copy).
    w1 = p_ref[0:Sp, :]                             # (Sp, H)
    b1 = p_ref[off_b1:off_b1 + 1, :].astype(jnp.float32)   # (1, H)
    w2 = p_ref[off_w2:off_w2 + H, :]                # (H, H)
    b2 = p_ref[off_b2:off_b2 + 1, :].astype(jnp.float32)   # (1, H)
    w3 = p_ref[off_w3:off_w3 + H, :]                # (H, H)
    b3 = p_ref[off_b3:off_b3 + 1, :].astype(jnp.float32)   # (1, H)

    # MXU matmuls with f32 accumulation; zero-padded lanes stay zero through ReLU.
    h1 = jnp.maximum(jnp.dot(x, w1, preferred_element_type=jnp.float32) + b1, 0.0)
    h2 = jnp.maximum(
        jnp.dot(h1.astype(cdt), w2, preferred_element_type=jnp.float32) + b2, 0.0)
    q = jnp.dot(h2.astype(cdt), w3, preferred_element_type=jnp.float32) + b3

    # Narrow (TB, A) store: output array is (B, A), so no wrapper slice needed.
    out_ref[...] = q[:, :A].astype(out_ref.dtype)


def qnetwork_forward(state, packed, meta, *, max_batch_tile=2048):
    """state: (B, state_size). packed/meta: from prepare_params (one-time)."""
    B, S = state.shape
    assert S == meta["S"], "state feature dim does not match packed params"
    Sp, H, A, R = meta["Sp"], meta["H"], meta["A"], meta["R"]

    x = state.astype(jnp.float32)
    TB, B_pad = _choose_batch_tiling(B, max_batch_tile)
    if B_pad != B:
        x = jnp.pad(x, ((0, B_pad - B), (0, 0)))
    ntiles = B_pad // TB

    kernel = functools.partial(
        _qnet_kernel, S=S, Sp=Sp, H=H, A=A,
        off_b1=meta["off_b1"], off_w2=meta["off_w2"], off_b2=meta["off_b2"],
        off_w3=meta["off_w3"], off_b3=meta["off_b3"])

    q = pl.pallas_call(
        kernel,
        out_shape=jax.ShapeDtypeStruct((B_pad, A), jnp.float32),
        grid=(ntiles,),
        in_specs=[
            pl.BlockSpec((TB, S), lambda i: (i, 0)),   # batch tile of states
            pl.BlockSpec((R, H), lambda i: (0, 0)),    # full packed params, resident
        ],
        out_specs=pl.BlockSpec((TB, A), lambda i: (i, 0)),
        compiler_params=pltpu.CompilerParams(
            dimension_semantics=("parallel",),          # shard batch tiles across TCs
        ),
    )(x, packed)

    return q if B_pad == B else q[:B]


def init_params(key, state_size, action_size, fc1_units=64, fc2_units=64):
    """Deterministic synthetic init matching nn.Linear shapes (uniform +-1/sqrt(fan_in))."""
    ks = jax.random.split(key, 6)

    def lin(kw, kb, fan_in, fan_out):
        bound = 1.0 / jnp.sqrt(fan_in)
        w = jax.random.uniform(kw, (fan_out, fan_in), jnp.float32, -bound, bound)
        b = jax.random.uniform(kb, (fan_out,), jnp.float32, -bound, bound)
        return w, b

    w1, b1 = lin(ks[0], ks[1], state_size, fc1_units)
    w2, b2 = lin(ks[2], ks[3], fc1_units, fc2_units)
    w3, b3 = lin(ks[4], ks[5], fc2_units, action_size)
    return {"w1": w1, "b1": b1, "w2": w2, "b2": b2, "w3": w3, "b3": b3}


def _reference(state, p):
    h1 = jnp.maximum(state @ p["w1"].T + p["b1"], 0.0)
    h2 = jnp.maximum(h1 @ p["w2"].T + p["b2"], 0.0)
    return h2 @ p["w3"].T + p["b3"]


if __name__ == "__main__":
    key = jax.random.PRNGKey(0)
    k_params, k_s1, k_s2 = jax.random.split(key, 3)

    state_size = 8      # LunarLander observation dim
    action_size = 4     # LunarLander action dim
    params = init_params(k_params, state_size, action_size, fc1_units=64, fc2_units=64)

    # --- f32-packed slab: exact match vs reference -------------------------
    packed_f32, meta_f32 = prepare_params(params, dtype=jnp.float32)

    state = jax.random.normal(k_s1, (8, state_size), jnp.float32)
    q = jax.block_until_ready(qnetwork_forward(state, packed_f32, meta_f32))
    q_ref = _reference(state, params)
    assert q.shape == (8, action_size)
    assert jnp.allclose(q, q_ref, atol=1e-5, rtol=1e-5), "f32 mismatch vs reference"

    # Multi-tile + batch-padding path (B=20 -> TB=16, padded to 32, 2 grid tiles).
    state2 = jax.random.normal(k_s2, (20, state_size), jnp.float32)
    q2 = jax.block_until_ready(qnetwork_forward(state2, packed_f32, meta_f32))
    assert q2.shape == (20, action_size)
    assert jnp.allclose(q2, _reference(state2, params), atol=1e-5, rtol=1e-5), \
        "f32 multi-tile mismatch vs reference"

    # --- default bf16-packed slab: halved weight DMA, MXU-native -----------
    packed_bf16, meta_bf16 = prepare_params(params)  # dtype=bfloat16
    q3 = jax.block_until_ready(qnetwork_forward(state, packed_bf16, meta_bf16))
    assert q3.shape == (8, action_size)
    assert jnp.allclose(q3, q_ref, atol=5e-2, rtol=5e-2), "bf16 mismatch vs reference"

    print("KERNEL_OK")
</pallas_src>

<mosaic_0001>
module attributes {stable_mosaic.version = 11 : i64} {
  func.func @_qnet_kernel(%arg0: i32, %arg1: memref<8x8xf32, #tpu.memory_space<vmem>>, %arg2: memref<320x128xf32, #tpu.memory_space<vmem>>, %arg3: memref<8x4xf32, #tpu.memory_space<vmem>>) attributes {dimension_semantics = [#tpu.dimension_semantics<parallel>], iteration_bounds = array<i64: 1>, scalar_prefetch = 0 : i64, scratch_operands = 0 : i64, tpu.core_type = #tpu.core_type<tc>, window_params = [{transform_indices = @transform_0, window_bounds = array<i64: 8, 8>}, {pipeline_mode = #tpu.pipeline_mode<synchronous>, transform_indices = @transform_1, window_bounds = array<i64: 320, 128>}, {transform_indices = @transform_2, window_bounds = array<i64: 8, 4>}]} {
    %c0 = arith.constant 0 : index
    %c0_0 = arith.constant 0 : index
    %0 = vector.load %arg1[%c0, %c0_0] : memref<8x8xf32, #tpu.memory_space<vmem>>, vector<8x8xf32>
    %c0_1 = arith.constant 0 : index
    %c0_2 = arith.constant 0 : index
    %1 = vector.load %arg2[%c0_1, %c0_2] : memref<320x128xf32, #tpu.memory_space<vmem>>, vector<8x128xf32>
    %c16 = arith.constant 16 : index
    %c0_3 = arith.constant 0 : index
    %2 = vector.load %arg2[%c16, %c0_3] : memref<320x128xf32, #tpu.memory_space<vmem>>, vector<1x128xf32>
    %c32 = arith.constant 32 : index
    %c0_4 = arith.constant 0 : index
    %3 = vector.load %arg2[%c32, %c0_4] : memref<320x128xf32, #tpu.memory_space<vmem>>, vector<128x128xf32>
    %c160 = arith.constant 160 : index
    %c0_5 = arith.constant 0 : index
    %4 = vector.load %arg2[%c160, %c0_5] : memref<320x128xf32, #tpu.memory_space<vmem>>, vector<1x128xf32>
    %c176 = arith.constant 176 : index
    %c0_6 = arith.constant 0 : index
    %5 = vector.load %arg2[%c176, %c0_6] : memref<320x128xf32, #tpu.memory_space<vmem>>, vector<128x128xf32>
    %c304 = arith.constant 304 : index
    %c0_7 = arith.constant 0 : index
    %6 = vector.load %arg2[%c304, %c0_7] : memref<320x128xf32, #tpu.memory_space<vmem>>, vector<1x128xf32>
    %cst = arith.constant dense<0.000000e+00> : vector<8x128xf32>
    %7 = tpu.matmul %0, %1, %cst {dimension_numbers = #tpu.dot_dimension_numbers<[1], [0], [0], [1], [0, 0, 1, 1], [], []>} : vector<8x8xf32>, vector<8x128xf32>, vector<8x128xf32> -> vector<8x128xf32>
    %8 = vector.broadcast %2 : vector<1x128xf32> to vector<8x128xf32>
    %9 = arith.addf %7, %8 : vector<8x128xf32>
    %cst_8 = arith.constant 0.000000e+00 : f32
    %10 = vector.broadcast %cst_8 : f32 to vector<8x128xf32>
    %11 = arith.maximumf %9, %10 : vector<8x128xf32>
    %cst_9 = arith.constant dense<0.000000e+00> : vector<8x128xf32>
    %12 = tpu.matmul %11, %3, %cst_9 {dimension_numbers = #tpu.dot_dimension_numbers<[1], [0], [0], [1], [0, 0, 1, 1], [], []>} : vector<8x128xf32>, vector<128x128xf32>, vector<8x128xf32> -> vector<8x128xf32>
    %13 = vector.broadcast %4 : vector<1x128xf32> to vector<8x128xf32>
    %14 = arith.addf %12, %13 : vector<8x128xf32>
    %cst_10 = arith.constant 0.000000e+00 : f32
    %15 = vector.broadcast %cst_10 : f32 to vector<8x128xf32>
    %16 = arith.maximumf %14, %15 : vector<8x128xf32>
    %cst_11 = arith.constant dense<0.000000e+00> : vector<8x128xf32>
    %17 = tpu.matmul %16, %5, %cst_11 {dimension_numbers = #tpu.dot_dimension_numbers<[1], [0], [0], [1], [0, 0, 1, 1], [], []>} : vector<8x128xf32>, vector<128x128xf32>, vector<8x128xf32> -> vector<8x128xf32>
    %18 = vector.broadcast %6 : vector<1x128xf32> to vector<8x128xf32>
    %19 = arith.addf %17, %18 : vector<8x128xf32>
    %20 = vector.extract_strided_slice %19 {offsets = [0, 0], sizes = [8, 4], strides = [1, 1]} : vector<8x128xf32> to vector<8x4xf32>
    %c0_12 = arith.constant 0 : index
    %c0_13 = arith.constant 0 : index
    %21 = vector.load %arg3[%c0_12, %c0_13] : memref<8x4xf32, #tpu.memory_space<vmem>>, vector<8x4xf32>
    tpu.vector_store %arg3[%c0_12, %c0_13], %20 {strides = array<i32>} : memref<8x4xf32, #tpu.memory_space<vmem>>, vector<8x4xf32>,
    return
  }
  func.func @transform_0(%arg0: i32) -> (i32, i32) {
    %c0_i32 = arith.constant 0 : i32
    %c0_i32_0 = arith.constant 0 : i32
    return %arg0, %c0_i32 : i32, i32
  }
  func.func @transform_1(%arg0: i32) -> (i32, i32) {
    %c0_i32 = arith.constant 0 : i32
    %c0_i32_0 = arith.constant 0 : i32
    %c0_i32_1 = arith.constant 0 : i32
    return %c0_i32, %c0_i32_0 : i32, i32
  }
  func.func @transform_2(%arg0: i32) -> (i32, i32) {
    %c0_i32 = arith.constant 0 : i32
    %c0_i32_0 = arith.constant 0 : i32
    return %arg0, %c0_i32 : i32, i32
  }
}

</mosaic_0001>

<bundles_post_ra>
// kernel: tpu_custom_call.1
= control target key start
LH: loop header
LB: loop body
LE: loop exit
PB: predicated region body
PF: predicated region fallthrough
CT: control target
= control target key end

     0   :  { %7 = vsyncpa [#allocation3], 0  ;;  %s243_s0 = inlined_call_operand.hbm [shape: f32[8,8], index: 0, kind: input, shape index: {}]   ;;  %s244_s1 = inlined_call_operand.hbm [shape: f32[320,128], index: 1, kind: input, shape index: {}]   ;;  %s245_s2 = inlined_call_operand.vmem [shape: f32[8,4], index: 2, kind: output, shape index: {}]  }
   0x1   :  { %s14_s11 = sshll.u32 %s243_s0, 4  ;;  %s15_s11 = int_to_ptr.hbm [resolvable:$true] %s14_s11 }
   0x2   :  { %8 = vsyncpa [#allocation5], 0  ;;  %s215_s12 = smov [#allocation2]   ;;  %s24_s16 = sshll.u32 %s244_s1, 4  ;;  %s25_s16 = int_to_ptr.hbm [resolvable:$true] %s24_s16 }
   0x3   :  { %s16_s13 = sshll.u32 %s215_s12, 4  ;;  %s216_s17 = smov [#allocation4]   ;;  %s17_s13 = int_to_ptr.vmem [resolvable:$true] %s16_s13 }
   0x4   :  { %19 = dma.hbm_to_vmem [thread:$0]  %s15_s11, 128, %s17_s13, [#allocation3]  }
   0x5   :  { %s26_s18 = sshll.u32 %s216_s17, 4  ;;  %s217_s19 = smov 128   ;;  %s27_s18 = int_to_ptr.vmem [resolvable:$true] %s26_s18 }
   0x6   :  { %s218_s20 = smov 8  }
   0x7   :  { %32 = dma.hbm_to_vmem [thread:$0]  %s25_s16, 5120, %s27_s18, [#allocation5], %s217_s19, %s217_s19, %s218_s20  }
   0x8   :  { %211 = dma.done.wait [#allocation3], 128  }
   0x9   :  { %212 = vsyncadd [#allocation3], 4294967168 }
   0xa   :  { %213 = dma.done.wait [#allocation5], 5120  }
   0xb   :  { %214 = vsyncadd [#allocation5], 4294962176  ;;  %vm79_vm0 = vcmask 64512   ;;  %v42_v0 = vld [vmem:[#allocation4] sm:$0xff]  ;;  %v41_v1 = vld [vmem:[#allocation2] sm:$0xff]  ;;  %vm147_vm1 = vcmask 31744  }
   0xc   :  { %v59_v2 = vld [vmem:[#allocation4 + $0x98] sm:$0xff]  ;;  %98 = vmatpush.msra.mxu0 %v42_v0  ;;  %v58_v3 = vld [vmem:[#allocation4 + $0x90] sm:$0xff]  ;;  %v57_v4 = vld [vmem:[#allocation4 + $0x88] sm:$0xff] }
   0xd   :  { %105 = vmatpush.msra.mxu1 %v59_v2  ;;  %155 = vmatmul.msk.f32.vlgmr.msra.gmra.mxu0 %vm79_vm0, %v41_v1  ;;  %v56_v5 = vld [vmem:[#allocation4 + $0x80] sm:$0xff]  ;;  %v55_v6 = vld [vmem:[#allocation4 + $0x78] sm:$0xff]  ;;  %v54_v7 = vld [vmem:[#allocation4 + $0x70] sm:$0xff] }
   0xe   :  { %v53_v8 = vld [vmem:[#allocation4 + $0x68] sm:$0xff]  ;;  %v52_v9 = vld [vmem:[#allocation4 + $0x60] sm:$0xff]  ;;  %v51_v10 = vld [vmem:[#allocation4 + $0x58] sm:$0xff] }
   0xf   :  { %106 = vmatpush.msra.mxu1 %v58_v3  ;;  %v50_v11 = vld [vmem:[#allocation4 + $0x50] sm:$0xff]  ;;  %v49_v12 = vld [vmem:[#allocation4 + $0x48] sm:$0xff]  ;;  %v48_v13 = vld [vmem:[#allocation4 + $0x40] sm:$0xff] }
  0x10   :  { %v47_v14 = vld [vmem:[#allocation4 + $0x38] sm:$0xff]  ;;  %v46_v15 = vld [vmem:[#allocation4 + $0x30] sm:$0xff]  ;;  %v45_v16 = vld [vmem:[#allocation4 + $0x28] sm:$0xff] }
  0x11   :  { %107 = vmatpush.msra.mxu1 %v57_v4  ;;  %v44_v17 = vld [vmem:[#allocation4 + $0x20] sm:$0xff]  ;;  %v76_v18 = vld [vmem:[#allocation4 + $0x128] sm:$0xff]  ;;  %v74_v20 = vld [vmem:[#allocation4 + $0x118] sm:$0xff] }
  0x12   :  { %v75_v19 = vld [vmem:[#allocation4 + $0x120] sm:$0xff]  ;;  %127 = vmatpush.msra.mxu2 %v76_v18  ;;  %v73_v21 = vld [vmem:[#allocation4 + $0x110] sm:$0xff]  ;;  %v72_v22 = vld [vmem:[#allocation4 + $0x108] sm:$0xff] }
  0x13   :  { %108 = vmatpush.msra.mxu1 %v56_v5  ;;  %v71_v23 = vld [vmem:[#allocation4 + $0x100] sm:$0xff]  ;;  %v70_v24 = vld [vmem:[#allocation4 + $0xf8] sm:$0xff]  ;;  %v69_v25 = vld [vmem:[#allocation4 + $0xf0] sm:$0xff] }
  0x14   :  { %128 = vmatpush.msra.mxu2 %v75_v19  ;;  %v68_v26 = vld [vmem:[#allocation4 + $0xe8] sm:$0xff]  ;;  %v67_v27 = vld [vmem:[#allocation4 + $0xe0] sm:$0xff]  ;;  %v66_v28 = vld [vmem:[#allocation4 + $0xd8] sm:$0xff] }
  0x15   :  { %109 = vmatpush.msra.mxu1 %v55_v6  ;;  %v65_v29 = vld [vmem:[#allocation4 + $0xd0] sm:$0xff]  ;;  %v64_v30 = vld [vmem:[#allocation4 + $0xc8] sm:$0xff]  ;;  %v63_v35 = vld [vmem:[#allocation4 + $0xc0] sm:$0xff] }
  0x16   :  { %129 = vmatpush.msra.mxu2 %v74_v20  ;;  %v160_v31 = vld [vmem:[#allocation4 + $0x10] ss:$0 sm:$0xff]  ;;  %v62_v36 = vld [vmem:[#allocation4 + $0xb8] sm:$0xff]  ;;  %v161_v38 = vld [vmem:[#allocation4 + $0xa0] ss:$0 sm:$0xff] }
  0x17   :  { %110 = vmatpush.msra.mxu1 %v54_v7  ;;  %v61_v37 = vld [vmem:[#allocation4 + $0xb0] sm:$0xff] }
  0x18   :  { %130 = vmatpush.msra.mxu2 %v73_v21  ;;  %v162_v42 = vld [vmem:[#allocation4 + $0x130] ss:$0 sm:$0xff] }
  0x19   :  { %111 = vmatpush.msra.mxu1 %v53_v8 }
  0x1a   :  { %131 = vmatpush.msra.mxu2 %v72_v22 }
  0x1b   :  { %112 = vmatpush.msra.mxu1 %v52_v9 }
  0x1c   :  { %132 = vmatpush.msra.mxu2 %v71_v23 }
  0x1d   :  { %113 = vmatpush.msra.mxu1 %v51_v10 }
  0x1e   :  { %133 = vmatpush.msra.mxu2 %v70_v24 }
  0x1f   :  { %114 = vmatpush.msra.mxu1 %v50_v11 }
  0x20   :  { %134 = vmatpush.msra.mxu2 %v69_v25 }
  0x21   :  { %115 = vmatpush.msra.mxu1 %v49_v12 }
  0x22   :  { %135 = vmatpush.msra.mxu2 %v68_v26 }
  0x23   :  { %116 = vmatpush.msra.mxu1 %v48_v13 }
  0x24   :  { %136 = vmatpush.msra.mxu2 %v67_v27 }
  0x25   :  { %117 = vmatpush.msra.mxu1 %v47_v14 }
  0x26   :  { %137 = vmatpush.msra.mxu2 %v66_v28 }
  0x27   :  { %118 = vmatpush.msra.mxu1 %v46_v15 }
  0x28   :  { %138 = vmatpush.msra.mxu2 %v65_v29 }
  0x29   :  { %119 = vmatpush.msra.mxu1 %v45_v16 }
  0x2a   :  { %139 = vmatpush.msra.mxu2 %v64_v30 }
  0x2b   :  { %120 = vmatpush.msra.mxu1 %v44_v17 }
  0x2c   :  { %140 = vmatpush.msra.mxu2 %v63_v35 }
  0x2e   :  { %141 = vmatpush.msra.mxu2 %v62_v36 }
  0x30   :  { %142 = vmatpush.msra.mxu2 %v61_v37 }
  0x8a   :  { %v100_v32 = vpop.f32.mrf.mxu0 }
  0x8b   :  { %v101_v33 = vadd.f32 %v160_v31, %v100_v32 }
  0x8d   :  { %v103_v34 = vmax.f32 %v101_v33, 0.0 }
  0x8f   :  { %121 = vmatmul.f32.vlgmr.msra.gmra.mxu1 %v103_v34 }
 0x10c   :  { %v122_v39 = vpop.f32.mrf.mxu1 }
 0x10d   :  { %v123_v40 = vadd.f32 %v161_v38, %v122_v39 }
 0x10f   :  { %v125_v41 = vmax.f32 %v123_v40, 0.0 }
 0x111   :  { %143 = vmatmul.f32.vlgmr.msra.gmra.mxu2 %v125_v41 }
 0x194   :  { %v144_v43 = vpop.f32.mrf.mxu2 }
 0x195   :  { %v145_v44 = vadd.f32 %v162_v42, %v144_v43 }
 0x197   :  { %148 = vst.msk [vmem:[%s245_s2] sm:$0xff] %vm147_vm1, %v145_v44 }
 0x198   :  { %153 = vsyncpa [#allocation3], 1 }
 0x199   :  { %154 = vsyncpa [#allocation5], 1 }

</bundles_post_ra>
